<compile_context>
chip_gen: v7x
topology: tpu7x:2x2x1
jax: 0.10.0
libtpu: 0.0.40
codegen_flags: <defaults>
</compile_context>

<pallas_src>
import functools

import jax
import jax.numpy as jnp
from jax.experimental import pallas as pl
from jax.experimental.pallas import tpu as pltpu

_M1 = 1.0
_M2 = 10.0

# Budget for the per-step (TB, TNi, TNj) f32 working set (~6 live temporaries
# -> ~12 MiB), safe against v5e's 16 MiB default scoped VMEM and v7x's 64 MiB
# physical VMEM once double-buffered inputs are added.
_MAX_TILE_ELEMS = 512 * 1024
_OUT_LANES = 128  # lane-dense partial-sum row per grid step (unmasked vst)


def _space_sim_loss_kernel(xi_ref, xj_ref, ti_ref, tj_ref, o_ref, *, m1, m2):
    """Partial hinge-loss sum for one (batch-tile, i-tile, j-tile) block.

    xi_ref: (TB, TNi, D)   rows of the pairwise-distance tile
    xj_ref: (TB, TNj, D)   cols of the pairwise-distance tile
    ti_ref: (TB, TNi, 1)   labels for the rows (sublane layout)
    tj_ref: (TB, 1, TNj)   labels for the cols (lane layout; no in-kernel transpose)
    o_ref : (1, 1, 128)    broadcast partial sum (lane-dense)
    """
    xi = xi_ref[...].astype(jnp.float32)
    xj = xj_ref[...].astype(jnp.float32)

    # ||x_i||^2 in (TB, TNi, 1) sublane layout (tiny D-wide lane reduce).
    sq_i = jnp.sum(xi * xi, axis=-1, keepdims=True)
    # ||x_j||^2 directly in (TB, 1, TNj) lane layout via an MXU contraction with
    # a ones row -- avoids an XLU transpose of the row-norm vector.
    ones_row = jnp.ones((xj.shape[0], 1, xj.shape[2]), jnp.float32)
    sq_j = jnp.einsum('bkd,bmd->bkm', ones_row, xj * xj,
                      preferred_element_type=jnp.float32)
    # Gram matrix: batched dot_general contracting D of both operands; the MXU
    # consumes the "transposed" operand directly (no x.T materialization).
    gram = jnp.einsum('bnd,bmd->bnm', xi, xj,
                      preferred_element_type=jnp.float32)

    d2 = jnp.maximum(sq_i + sq_j - 2.0 * gram, 0.0)
    dist = jnp.sqrt(d2)                                        # EUP slot

    # gt-distance |t_i - t_j| == 0  <=>  labels equal.
    same = ti_ref[...] == tj_ref[...]                          # (TB, TNi, TNj)
    # Single select + single clamp (one hinge max instead of two).
    elem = jnp.maximum(jnp.where(same, dist - m1, m2 - dist), 0.0)

    # Sublane-first VPU reduction (batch + i axes), then one lane reduce.
    lane_partials = jnp.sum(elem, axis=(0, 1), keepdims=True)  # (1, 1, TNj)
    s = jnp.sum(lane_partials)
    o_ref[...] = jnp.full(o_ref.shape, s, dtype=o_ref.dtype)


def _largest_divisor(n, cap, multiple_of):
    for d in range(min(n, cap), 0, -1):
        if n % d == 0 and d % multiple_of == 0:
            return d
    return None


def _choose_tiles(B, N):
    """Pick (TB, TNi, TNj) so the N_i x N_j working set stays within VMEM budget."""
    if N * N <= _MAX_TILE_ELEMS:
        tni = tnj = N
    else:
        # i-tile on sublanes (multiple of 8), j-tile on lanes (multiple of 128);
        # fall back to the full extent when no aligned divisor exists.
        tni = _largest_divisor(N, 512, 8) or N
        tnj = _largest_divisor(N, 512, 128) or N
        # TODO(synk): pad N to an aligned size instead of falling back to full-N
        # tiles when N has no 8/128-aligned divisor (huge prime N could overflow VMEM).
    tile = tni * tnj
    tb = 1
    for d in range(1, B + 1):
        if B % d == 0 and d * tile <= max(_MAX_TILE_ELEMS, tile):
            tb = d
    return tb, tni, tnj


def space_similarity_loss_v2(x, target, m1=_M1, m2=_M2):
    """x: (B, N, D) float, target: (B, N) numeric labels. Returns scalar f32 loss."""
    B, N, D = x.shape
    x = x.astype(jnp.float32)
    # Matches torch: target.float() before the (gt-distance == 0) comparison.
    t = target.astype(jnp.float32)
    t_row = t.reshape(B, N, 1)   # labels on the sublane axis
    t_col = t.reshape(B, 1, N)   # labels on the lane axis (transpose done in XLA, once)

    tb, tni, tnj = _choose_tiles(B, N)
    gb, ni, nj = B // tb, N // tni, N // tnj
    n_blocks = gb * ni * nj

    kernel = functools.partial(_space_sim_loss_kernel, m1=float(m1), m2=float(m2))

    cost = pl.CostEstimate(
        flops=int(2 * B * N * N * D + 4 * B * N * D + 8 * B * N * N),
        transcendentals=int(B * N * N),
        bytes_accessed=int(2 * x.size * 4 + 2 * t.size * 4
                           + n_blocks * _OUT_LANES * 4),
    )

    out = pl.pallas_call(
        kernel,
        out_shape=jax.ShapeDtypeStruct((n_blocks, 1, _OUT_LANES), jnp.float32),
        grid_spec=pltpu.PrefetchScalarGridSpec(
            num_scalar_prefetch=0,
            grid=(gb, ni, nj),
            in_specs=[
                # i-rows block: resident across the innermost j axis.
                pl.BlockSpec((tb, tni, D), lambda g, i, j: (g, i, 0)),
                # j-cols block: streamed along j.
                pl.BlockSpec((tb, tnj, D), lambda g, i, j: (g, j, 0)),
                pl.BlockSpec((tb, tni, 1), lambda g, i, j: (g, i, 0)),
                pl.BlockSpec((tb, 1, tnj), lambda g, i, j: (g, 0, j)),
            ],
            out_specs=pl.BlockSpec(
                (1, 1, _OUT_LANES),
                lambda g, i, j: (g * (ni * nj) + i * nj + j, 0, 0),
            ),
        ),
        compiler_params=pltpu.CompilerParams(
            dimension_semantics=("parallel", "parallel", "parallel"),
            vmem_limit_bytes=32 * 1024 * 1024,
        ),
        cost_estimate=cost,
    )(x, x, t_row, t_col)

    # Tiny final reduce over per-tile partial sums, then the mean normalization.
    return jnp.sum(out[:, 0, 0]) / (B * N * N)


def _reference_loss(x, target, m1=_M1, m2=_M2):
    """Pure-JAX reference mirroring the PyTorch module (exact pairwise diffs)."""
    x = x.astype(jnp.float32)
    t = target.astype(jnp.float32)
    diff = x[:, :, None, :] - x[:, None, :, :]
    dist_pred = jnp.sqrt(jnp.maximum(jnp.sum(diff * diff, axis=-1), 0.0))
    dist_gt = jnp.abs(t[:, :, None] - t[:, None, :])
    elem = jnp.where(
        dist_gt == 0,
        jnp.maximum(dist_pred - m1, 0.0),
        jnp.maximum(m2 - dist_pred, 0.0),
    )
    return jnp.mean(elem)


if __name__ == "__main__":
    key = jax.random.PRNGKey(0)
    kx, kt = jax.random.split(key)

    B, N, D = 2, 16, 8
    x = jax.random.normal(kx, (B, N, D), dtype=jnp.float32)
    target = jax.random.randint(kt, (B, N), 0, 4)     # integer cluster labels

    loss = space_similarity_loss_v2(x, target)
    jax.block_until_ready(loss)

    ref = _reference_loss(x, target)
    assert jnp.allclose(loss, ref, atol=1e-4, rtol=1e-4), (loss, ref)

    print("KERNEL_OK")
</pallas_src>

<mosaic_0001>
module attributes {stable_mosaic.version = 11 : i64} {
  func.func @_space_sim_loss_kernel(%arg0: i32, %arg1: i32, %arg2: i32, %arg3: memref<2x16x8xf32, #tpu.memory_space<vmem>>, %arg4: memref<2x16x8xf32, #tpu.memory_space<vmem>>, %arg5: memref<2x16x1xf32, #tpu.memory_space<vmem>>, %arg6: memref<2x1x16xf32, #tpu.memory_space<vmem>>, %arg7: memref<1x1x128xf32, #tpu.memory_space<vmem>>) attributes {dimension_semantics = [#tpu.dimension_semantics<parallel>, #tpu.dimension_semantics<parallel>, #tpu.dimension_semantics<parallel>], iteration_bounds = array<i64: 1, 1, 1>, scalar_prefetch = 0 : i64, scratch_operands = 0 : i64, tpu.core_type = #tpu.core_type<tc>, window_params = [{transform_indices = @transform_0, window_bounds = array<i64: 2, 16, 8>}, {transform_indices = @transform_1, window_bounds = array<i64: 2, 16, 8>}, {transform_indices = @transform_2, window_bounds = array<i64: 2, 16, 1>}, {transform_indices = @transform_3, window_bounds = array<i64: 2, 1, 16>}, {transform_indices = @transform_4, window_bounds = array<i64: 1, 1, 128>}]} {
    %c0 = arith.constant 0 : index
    %c0_0 = arith.constant 0 : index
    %c0_1 = arith.constant 0 : index
    %0 = vector.load %arg3[%c0, %c0_0, %c0_1] : memref<2x16x8xf32, #tpu.memory_space<vmem>>, vector<2x16x8xf32>
    %c0_2 = arith.constant 0 : index
    %c0_3 = arith.constant 0 : index
    %c0_4 = arith.constant 0 : index
    %1 = vector.load %arg4[%c0_2, %c0_3, %c0_4] : memref<2x16x8xf32, #tpu.memory_space<vmem>>, vector<2x16x8xf32>
    %2 = arith.mulf %0, %0 : vector<2x16x8xf32>
    %cst = arith.constant dense<0.000000e+00> : vector<2x16xf32>
    %3 = vector.multi_reduction <add>, %2, %cst [2] : vector<2x16x8xf32> to vector<2x16xf32>
    %4 = vector.shape_cast %3 : vector<2x16xf32> to vector<2x16x1xf32>
    %cst_5 = arith.constant 1.000000e+00 : f32
    %5 = vector.broadcast %cst_5 : f32 to vector<2x1x8xf32>
    %6 = arith.mulf %1, %1 : vector<2x16x8xf32>
    "tpu.trace_start"() <{level = 10 : i32, message = "bkd,bmd->bkm"}> : () -> ()
    %cst_6 = arith.constant dense<0.000000e+00> : vector<2x1x16xf32>
    %7 = tpu.matmul %5, %6, %cst_6 {dimension_numbers = #tpu.dot_dimension_numbers<[2], [2], [1], [1], [0, 0, 0, 1, 1, 1], [0], [0]>} : vector<2x1x8xf32>, vector<2x16x8xf32>, vector<2x1x16xf32> -> vector<2x1x16xf32>
    "tpu.trace_stop"() : () -> ()
    "tpu.trace_start"() <{level = 10 : i32, message = "bnd,bmd->bnm"}> : () -> ()
    %cst_7 = arith.constant dense<0.000000e+00> : vector<2x16x16xf32>
    %8 = tpu.matmul %0, %1, %cst_7 {dimension_numbers = #tpu.dot_dimension_numbers<[2], [2], [1], [1], [0, 0, 0, 1, 1, 1], [0], [0]>} : vector<2x16x8xf32>, vector<2x16x8xf32>, vector<2x16x16xf32> -> vector<2x16x16xf32>
    "tpu.trace_stop"() : () -> ()
    %9 = vector.broadcast %4 : vector<2x16x1xf32> to vector<2x16x16xf32>
    %10 = vector.broadcast %7 : vector<2x1x16xf32> to vector<2x16x16xf32>
    %11 = arith.addf %9, %10 : vector<2x16x16xf32>
    %cst_8 = arith.constant 2.000000e+00 : f32
    %12 = vector.broadcast %cst_8 : f32 to vector<2x16x16xf32>
    %13 = arith.mulf %12, %8 : vector<2x16x16xf32>
    %14 = arith.subf %11, %13 : vector<2x16x16xf32>
    %cst_9 = arith.constant 0.000000e+00 : f32
    %15 = vector.broadcast %cst_9 : f32 to vector<2x16x16xf32>
    %16 = arith.maximumf %14, %15 : vector<2x16x16xf32>
    %17 = math.sqrt %16 : vector<2x16x16xf32>
    %c0_10 = arith.constant 0 : index
    %c0_11 = arith.constant 0 : index
    %c0_12 = arith.constant 0 : index
    %18 = vector.load %arg5[%c0_10, %c0_11, %c0_12] : memref<2x16x1xf32, #tpu.memory_space<vmem>>, vector<2x16x1xf32>
    %c0_13 = arith.constant 0 : index
    %c0_14 = arith.constant 0 : index
    %c0_15 = arith.constant 0 : index
    %19 = vector.load %arg6[%c0_13, %c0_14, %c0_15] : memref<2x1x16xf32, #tpu.memory_space<vmem>>, vector<2x1x16xf32>
    %20 = vector.broadcast %18 : vector<2x16x1xf32> to vector<2x16x16xf32>
    %21 = vector.broadcast %19 : vector<2x1x16xf32> to vector<2x16x16xf32>
    %22 = arith.cmpf oeq, %20, %21 : vector<2x16x16xf32>
    %cst_16 = arith.constant 1.000000e+00 : f32
    %23 = vector.broadcast %cst_16 : f32 to vector<2x16x16xf32>
    %24 = arith.subf %17, %23 : vector<2x16x16xf32>
    %cst_17 = arith.constant 1.000000e+01 : f32
    %25 = vector.broadcast %cst_17 : f32 to vector<2x16x16xf32>
    %26 = arith.subf %25, %17 : vector<2x16x16xf32>
    %27 = arith.select %22, %24, %26 : vector<2x16x16xi1>, vector<2x16x16xf32>
    %cst_18 = arith.constant 0.000000e+00 : f32
    %28 = vector.broadcast %cst_18 : f32 to vector<2x16x16xf32>
    %29 = arith.maximumf %27, %28 : vector<2x16x16xf32>
    %cst_19 = arith.constant dense<0.000000e+00> : vector<16xf32>
    %30 = vector.multi_reduction <add>, %29, %cst_19 [0, 1] : vector<2x16x16xf32> to vector<16xf32>
    %31 = vector.shape_cast %30 : vector<16xf32> to vector<1x1x16xf32>
    %32 = vector.shape_cast %31 : vector<1x1x16xf32> to vector<1x1x1x16xf32>
    %cst_20 = arith.constant dense<0.000000e+00> : vector<1xf32>
    %33 = vector.multi_reduction <add>, %32, %cst_20 [1, 2, 3] : vector<1x1x1x16xf32> to vector<1xf32>
    %34 = vector.shape_cast %33 : vector<1xf32> to vector<1x1x1x1xf32>
    %35 = vector.extract %34[0, 0, 0, 0] : f32 from vector<1x1x1x1xf32>
    %36 = vector.broadcast %35 : f32 to vector<1x1x128xf32>
    %c0_21 = arith.constant 0 : index
    %c0_22 = arith.constant 0 : index
    %c0_23 = arith.constant 0 : index
    %37 = vector.load %arg7[%c0_21, %c0_22, %c0_23] : memref<1x1x128xf32, #tpu.memory_space<vmem>>, vector<1x1x128xf32>
    tpu.vector_store %arg7[%c0_21, %c0_22, %c0_23], %36 {strides = array<i32>} : memref<1x1x128xf32, #tpu.memory_space<vmem>>, vector<1x1x128xf32>,
    return
  }
  func.func @transform_0(%arg0: i32, %arg1: i32, %arg2: i32) -> (i32, i32, i32) {
    %c0_i32 = arith.constant 0 : i32
    %c0_i32_0 = arith.constant 0 : i32
    return %arg0, %arg1, %c0_i32 : i32, i32, i32
  }
  func.func @transform_1(%arg0: i32, %arg1: i32, %arg2: i32) -> (i32, i32, i32) {
    %c0_i32 = arith.constant 0 : i32
    %c0_i32_0 = arith.constant 0 : i32
    return %arg0, %arg2, %c0_i32 : i32, i32, i32
  }
  func.func @transform_2(%arg0: i32, %arg1: i32, %arg2: i32) -> (i32, i32, i32) {
    %c0_i32 = arith.constant 0 : i32
    %c0_i32_0 = arith.constant 0 : i32
    return %arg0, %arg1, %c0_i32 : i32, i32, i32
  }
  func.func @transform_3(%arg0: i32, %arg1: i32, %arg2: i32) -> (i32, i32, i32) {
    %c0_i32 = arith.constant 0 : i32
    %c0_i32_0 = arith.constant 0 : i32
    return %arg0, %c0_i32, %arg2 : i32, i32, i32
  }
  func.func @transform_4(%arg0: i32, %arg1: i32, %arg2: i32) -> (i32, i32, i32) {
    %c1_i32 = arith.constant 1 : i32
    %0 = arith.muli %arg0, %c1_i32 : i32
    %c1_i32_0 = arith.constant 1 : i32
    %1 = arith.muli %arg1, %c1_i32_0 : i32
    %2 = arith.addi %0, %1 : i32
    %3 = arith.addi %2, %arg2 : i32
    %c0_i32 = arith.constant 0 : i32
    %c0_i32_1 = arith.constant 0 : i32
    %c0_i32_2 = arith.constant 0 : i32
    return %3, %c0_i32, %c0_i32_1 : i32, i32, i32
  }
}

</mosaic_0001>

<bundles_post_ra>
// kernel: tpu_custom_call.1
= control target key start
LH: loop header
LB: loop body
LE: loop exit
PB: predicated region body
PF: predicated region fallthrough
CT: control target
= control target key end

     0   :  { %vm32_vm0 = vcmask 64512   ;;  %v657_v3 = vmov 0.0|0.0   ;;  %vm658_vm2 = vmmov 0   ;;  %v659_v10 = vmov 0.0   ;;  %s780_s0 = inlined_call_operand.vmem [shape: f32[2,16,8], index: 0, kind: input, shape index: {}]   ;;  %s781_s1 = inlined_call_operand.vmem [shape: f32[2,16,8], index: 1, kind: input, shape index: {}]   ;;  %s782_s2 = inlined_call_operand.vmem [shape: f32[2,16,1], index: 2, kind: input, shape index: {}]   ;;  %s783_s3 = inlined_call_operand.vmem [shape: f32[2,1,16], index: 3, kind: input, shape index: {}]   ;;  %s784_s4 = inlined_call_operand.hbm [shape: f32[1,1,128], index: 4, kind: output, shape index: {}]  }
   0x1   :  { %v24_v0 = vld [vmem:[%s781_s1] sm:$0xff]  ;;  %v25_v1 = vld [vmem:[%s781_s1 + $0x8] sm:$0xff]  ;;  %v26_v2 = vld [vmem:[%s781_s1 + $0x10] sm:$0xff]  ;;  %595 = vmatprep.subr.bf16.mxu0 %v657_v3  ;;  %599 = vmatprep.subr.bf16.mxu1 %v657_v3 }
   0x2   :  { %v45_v4 = vmul.f32 %v24_v0, %v24_v0  ;;  %v46_v5 = vmul.f32 %v25_v1, %v25_v1  ;;  %v27_v6 = vld [vmem:[%s781_s1 + $0x18] sm:$0xff]  ;;  %v47_v7 = vmul.f32 %v26_v2, %v26_v2  ;;  %vm702_vm1 = vmpackc.low %vm32_vm0, %vm32_vm0  ;;  %571 = vmatprep.mubr.msk.f32.mxu0 %vm658_vm2, %v659_v10  ;;  %578 = vmatprep.mubr.msk.f32.mxu1 %vm658_vm2, %v659_v10  ;;  %v20_v12 = vld [vmem:[%s780_s0] sm:$0xff] }
   0x3   :  { %v48_v9 = vmul.f32 %v27_v6, %v27_v6  ;;  %v603_v11 = vpack.c.bf16 %v25_v1, %v24_v0  ;;  %v22_v13 = vld [vmem:[%s780_s0 + $0x10] sm:$0xff]  ;;  %v609_v15 = vpack.c.bf16 %v27_v6, %v26_v2  ;;  %v21_v16 = vld [vmem:[%s780_s0 + $0x8] sm:$0xff]  ;;  %v28_v17 = vmul.f32 %v20_v12, %v20_v12  ;;  %v23_v20 = vld [vmem:[%s780_s0 + $0x18] sm:$0xff] }
   0x4   :  { %v596_v14 = vpack.c.bf16 %v46_v5, %v45_v4  ;;  %v30_v18 = vmul.f32 %v22_v13, %v22_v13  ;;  %v29_v21 = vmul.f32 %v21_v16, %v21_v16 }
   0x5   :  { %v600_v19 = vpack.c.bf16 %v48_v9, %v47_v7 }
   0x6   :  { %9 = vsyncpa [#allocation3], 0  ;;  %598 = vmatpush3.bf16.xpose.msk.msra.mxu0 %vm702_vm1, %v596_v14  ;;  %v33_v22 = vsel %vm32_vm0, %v28_v17, 0.0  ;;  %v39_v23 = vsel %vm32_vm0, %v30_v18, 0.0  ;;  %v31_v24 = vmul.f32 %v23_v20, %v23_v20  ;;  %v660_v25 = vmov 0   ;;  %v431_v29 = vld [vmem:[%s782_s2 + $0x8] sm:$0xff] }
   0x7   :  { %624 = vset.pattern.permute.xlu1 %v660_v25  ;;  %602 = vmatpush3.bf16.xpose.msk.msra.mxu1 %vm702_vm1, %v600_v19  ;;  %v36_v26 = vsel %vm32_vm0, %v29_v21, 0.0  ;;  %v661_v28 = vmov 1.0   ;;  %v432_v30 = vld [vmem:[%s782_s2 + $0x10] sm:$0xff]  ;;  %v430_v31 = vld [vmem:[%s782_s2] sm:$0xff]  ;;  %v433_v32 = vld [vmem:[%s782_s2 + $0x18] sm:$0xff]  ;;  %v378_v33 = vlaneseq  ;;  %vm488_vm3 = vcmask 130048  }
   0x8   :  { %605 = vmatprep.subr.msk.bf16.mxu0 %vm702_vm1, %v603_v11  ;;  %611 = vmatprep.subr.msk.bf16.mxu1 %vm702_vm1, %v609_v15  ;;  %v42_v27 = vsel %vm32_vm0, %v31_v24, 0.0  ;;  %v547_v3 = vld [vmem:[%s783_s3] ss:$0 sm:$0xff] }
   0x9   :  { %34 = vadd.xlane.f32.xlu0 %v33_v22  ;;  %40 = vadd.xlane.f32.xlu1 %v39_v23  ;;  %v379_v34 = vshrl.u32 %v378_v33, 7  ;;  %v548_v23 = vld [vmem:[%s783_s3 + $0x1] ss:$0 sm:$0xff]  ;;  %s662_s3 = smov [#allocation2]  }
   0xa   :  { %623 = vset.pattern.permute.xlu0 %v660_v25  ;;  %s525_s14 = sshll.u32 %s662_s3, 4  ;;  %s526_s14 = int_to_ptr.vmem [resolvable:$true] %s525_s14 }
   0xb   :  { %v380_v38 = vsub.s32 0, %v379_v34  ;;  %s633_s16 = scalar_lea.vmem %s526_s14, 16  ;;  %s637_s17 = scalar_lea.vmem %s526_s14, 32 }
   0xc   :  { %p634_p0 = scmp.ne.s32.totalorder %s526_s14, %s633_s16  ;;  %p638_p1 = scmp.lt.s32.totalorder %s526_s14, %s526_s14 }
   0xd   :  { %37 = vadd.xlane.f32.xlu0 %v36_v26  ;;  %572 = vmatmul.mubr.msk.f32.vlgmr.msra.gmra.mrb[0].mxu0 %vm32_vm0, %v661_v28  ;;  %p639_p2 = scmp.lt.s32.totalorder %s637_s17, %s633_s16 }
   0xe   :  { %43 = vadd.xlane.f32.xlu1 %v42_v27  ;;  %579 = vmatmul.mubr.msk.f32.vlgmr.msra.gmra.mrb[0].mxu1 %vm32_vm0, %v661_v28 }
   0xf   :  { %608 = vmatpush3.bf16.xpose.msk.msra.mxu0 %vm702_vm1, %v603_v11  ;;  %614 = vmatpush3.bf16.xpose.msk.msra.mxu1 %vm702_vm1, %v609_v15  ;;  %p640_p3 = por %p639_p2, %p638_p1 }
  0x10   :  { %585 = vmatprep.mubr.msk.f32.mxu0 %vm32_vm0, %v20_v12  ;;  %592 = vmatprep.mubr.msk.f32.mxu1 %vm32_vm0, %v22_v13 }
  0x11   :  { %p641_p4 = pnand %p640_p3, %p634_p0 }
  0x16   :  { %586 = vmatmul.mubr.msk.f32.vlgmr.msra.gmra.mrb[2].mxu0 %vm32_vm0, %v21_v16  ;;  %593 = vmatmul.mubr.msk.f32.vlgmr.msra.gmra.mrb[2].mxu1 %vm32_vm0, %v23_v20  ;;  %vm502_vm0 = vcmask 122880  }
  0x1f   :  { %443 = vperm.xlu1 %624, %v431_v29  }
  0x23   :  { %448 = vperm.xlu1 %624, %v432_v30   ;;  %438 = vperm.xlu0 %623, %v430_v31  }
  0x27   :  { %453 = vperm.xlu1 %624, %v433_v32  }
  0x96   :  { %v35_v35 = vpop.xlane.xlu0 %34  ;;  %v41_v37 = vpop.xlane.xlu1 %40 }
  0x9a   :  { %v38_v44 = vpop.xlane.xlu0 %37 }
  0x9b   :  { %v44_v45 = vpop.xlane.xlu1 %43 }
  0x9f   :  { %v444_v2 = vpop.permute.xlu1 %443 }
  0xa0   :  { %vm469_vm4 = vcmp.eq.f32.partialorder %v444_v2, %v547_v3 }
  0xa2   :  { %v439_v4 = vpop.permute.xlu0 %438 }
  0xa3   :  { %v449_v5 = vpop.permute.xlu1 %448  ;;  %vm468_vm7 = vcmp.eq.f32.partialorder %v439_v4, %v547_v3 }
  0xa4   :  { %vm470_vm15 = vcmp.eq.f32.partialorder %v449_v5, %v548_v23 }
  0xa7   :  { %v454_v25 = vpop.permute.xlu1 %453 }
  0xa8   :  { %vm471_vm14 = vcmp.eq.f32.partialorder %v454_v25, %v548_v23 }
  0xe0   :  { %v124_v36 = vpop.f32.mrb[0].mxu0 }
  0xe1   :  { %v573_v39 = vpop.f32.mrb[1].mxu0  ;;  %v200_v40 = vpop.f32.mrb[0].mxu1  ;;  %v381_v42 = vrot.slane %v124_v36, %v380_v38 }
  0xe2   :  { %v580_v41 = vpop.f32.mrb[1].mxu1  ;;  %v385_v43 = vrot.slane %v200_v40, %v380_v38 }
  0xe3   :  { %v387_v47 = vadd.f32 %v381_v42, %v38_v44  ;;  %v386_v51 = vadd.f32 %v381_v42, %v35_v35 }
  0xe4   :  { %v389_v52 = vadd.f32 %v385_v43, %v44_v45  ;;  %v388_v56 = vadd.f32 %v385_v43, %v41_v37 }
  0xe9   :  { %v587_v46 = vpop.f32.mrb[2].mxu0  ;;  %v594_v49 = vpop.f32.mrb[2].mxu1 }
  0xea   :  { %v391_v48 = vmul.f32 2.0, %v587_v46  ;;  %v282_v50 = vpop.f32.mrb[3].mxu0  ;;  %v393_v53 = vmul.f32 2.0, %v594_v49  ;;  %v369_v55 = vpop.f32.mrb[3].mxu1 }
  0xeb   :  { %v390_v54 = vmul.f32 2.0, %v282_v50  ;;  %v392_v58 = vmul.f32 2.0, %v369_v55 }
  0xec   :  { %v395_v57 = vsub.f32 %v387_v47, %v391_v48  ;;  %v397_v59 = vsub.f32 %v389_v52, %v393_v53 }
  0xed   :  { %v394_v60 = vsub.f32 %v386_v51, %v390_v54  ;;  %v396_v62 = vsub.f32 %v388_v56, %v392_v58 }
  0xee   :  { %v399_v61 = vmax.f32 %v395_v57, 0.0  ;;  %v401_v63 = vmax.f32 %v397_v59, 0.0 }
  0xef   :  { %v398_v0 = vmax.f32 %v394_v60, 0.0  ;;  %v400_v1 = vmax.f32 %v396_v62, 0.0 }
  0xf0   :  { %625 = vrsqrt.f32 %v399_v61  ;;  %vm411_vm5 = vcmp.eq.f32.partialorder %v399_v61, inf  ;;  %vm413_vm6 = vcmp.eq.f32.partialorder %v399_v61, 0.0  ;;  %v414_v7 = vand.u32 2147483648, %v399_v61 }
  0xf1   :  { %627 = vrsqrt.f32 %v401_v63  ;;  %vm418_vm8 = vcmp.eq.f32.partialorder %v400_v1, inf  ;;  %vm425_vm9 = vcmp.eq.f32.partialorder %v401_v63, inf  ;;  %vm427_vm10 = vcmp.eq.f32.partialorder %v401_v63, 0.0 }
  0xf2   :  { %629 = vrsqrt.f32 %v398_v0  ;;  %vm420_vm11 = vcmp.eq.f32.partialorder %v400_v1, 0.0  ;;  %v421_v11 = vand.u32 2147483648, %v400_v1  ;;  %v428_v13 = vand.u32 2147483648, %v401_v63 }
  0xf3   :  { %631 = vrsqrt.f32 %v400_v1  ;;  %vm404_vm12 = vcmp.eq.f32.partialorder %v398_v0, inf  ;;  %vm406_vm13 = vcmp.eq.f32.partialorder %v398_v0, 0.0  ;;  %v407_v20 = vand.u32 2147483648, %v398_v0 }
  0xfa   :  { %v626_v6 = vpop.eup %625 }
  0xfb   :  { %v628_v8 = vpop.eup %627  ;;  %v410_v9 = vmul.f32 %v626_v6, %v399_v61 }
  0xfc   :  { %v630_v10 = vpop.eup %629  ;;  %v424_v12 = vmul.f32 %v628_v8, %v401_v63 }
  0xfd   :  { %v632_v14 = vpop.eup %631  ;;  %v412_v15 = vsel %vm411_vm5, %v399_v61, %v410_v9  ;;  %v403_v16 = vmul.f32 %v630_v10, %v398_v0 }
  0xfe   :  { %v415_v17 = vsel %vm413_vm6, %v414_v7, %v412_v15  ;;  %v417_v18 = vmul.f32 %v632_v14, %v400_v1  ;;  %v426_v19 = vsel %vm425_vm9, %v401_v63, %v424_v12 }
  0xff   :  { %v550_v21 = vadd.f32 -1.0, %v415_v17  ;;  %v477_v22 = vsub.f32 10.0, %v415_v17  ;;  %v429_v24 = vsel %vm427_vm10, %v428_v13, %v426_v19  ;;  %v405_v26 = vsel %vm404_vm12, %v398_v0, %v403_v16 }
 0x100   :  { %v419_v27 = vsel %vm418_vm8, %v400_v1, %v417_v18  ;;  %v552_v28 = vadd.f32 -1.0, %v429_v24  ;;  %v479_v29 = vsub.f32 10.0, %v429_v24  ;;  %v408_v30 = vsel %vm406_vm13, %v407_v20, %v405_v26 }
 0x101   :  { %v481_v31 = vsel %vm469_vm4, %v550_v21, %v477_v22  ;;  %v422_v32 = vsel %vm420_vm11, %v421_v11, %v419_v27  ;;  %v549_v33 = vadd.f32 -1.0, %v408_v30  ;;  %v476_v34 = vsub.f32 10.0, %v408_v30 }
 0x102   :  { %v485_v35 = vmax.f32 %v481_v31, 0.0  ;;  %v551_v36 = vadd.f32 -1.0, %v422_v32  ;;  %v478_v37 = vsub.f32 10.0, %v422_v32  ;;  %v483_v38 = vsel %vm471_vm14, %v552_v28, %v479_v29 }
 0x103   :  { %v480_v39 = vsel %vm468_vm7, %v549_v33, %v476_v34  ;;  %v487_v44 = vmax.f32 %v483_v38, 0.0 }
 0x104   :  { %v490_v40 = vsel %vm488_vm3, %v485_v35, 0.0  ;;  %v482_v41 = vsel %vm470_vm15, %v551_v36, %v478_v37  ;;  %v484_v42 = vmax.f32 %v480_v39, 0.0 }
 0x105   :  { %v486_v43 = vmax.f32 %v482_v41, 0.0  ;;  %v494_v49 = vsel %vm488_vm3, %v487_v44, 0.0 }
 0x106   :  { %v489_v45 = vsel %vm488_vm3, %v484_v42, 0.0 }
 0x107   :  { %v491_v46 = vadd.f32 %v490_v40, %v489_v45  ;;  %v492_v47 = vsel %vm488_vm3, %v486_v43, 0.0 }
 0x109   :  { %v493_v48 = vadd.f32 %v492_v47, %v491_v46 }
 0x10b   :  { %v495_v50 = vadd.f32 %v494_v49, %v493_v48 }
 0x10d   :  { %v496_v51 = vrot.slane %v495_v50, 4 }
 0x10f   :  { %v497_v52 = vadd.f32 %v496_v51, %v495_v50 }
 0x111   :  { %v498_v53 = vrot.slane %v497_v52, 2 }
 0x113   :  { %v499_v54 = vadd.f32 %v498_v53, %v497_v52 }
 0x115   :  { %v500_v55 = vrot.slane %v499_v54, 1 }
 0x117   :  { %v501_v56 = vadd.f32 %v500_v55, %v499_v54 }
 0x119   :  { %v503_v57 = vsel %vm502_vm0, %v501_v56, 0.0 }
 0x11a   :  { %504 = vadd.xlane.f32.xlu1 %v503_v57 }
 0x1a7   :  { %v505_v58 = vpop.xlane.xlu1 %504 }
 0x1a8   :  { %v506_v59 = vrot.slane %v505_v58, 4 }
 0x1aa   :  { %v507_v60 = vadd.f32 %v506_v59, %v505_v58 }
 0x1ac   :  { %v508_v61 = vrot.slane %v507_v60, 2 }
 0x1ae   :  { %v509_v62 = vadd.f32 %v508_v61, %v507_v60 }
 0x1b0   :  { %v510_v63 = vrot.slane %v509_v62, 1 }
 0x1b2   :  { %v511_v0 = vadd.f32 %v510_v63, %v509_v62 }
 0x1b4   :  { %615 = vpush %v511_v0 }
 0x1e5   :  { %s616_s15 = spop %615 }
 0x1e6   :  { %v513_v1 = vstv %s616_s15 }
 0x1e7   :  { %514 = vst [vmem:[#allocation2] sm:$0x1] %v513_v1 }
 0x1e8   :  { %644 = shalt.err (!%p641_p4)
}
 0x1e9   :  { %s645_s20 = scalar_lea.hbm %s784_s4, 16 }
 0x1ea   :  { %p646_p5 = scmp.ne.s32.totalorder %s784_s4, %s645_s20  ;;  %p649_p6 = scmp.lt.u32.totalorder %s645_s20, %s784_s4 }
 0x1ec   :  { %p651_p7 = pnand %p649_p6, %p646_p5 }
 0x1ee   :  { %654 = shalt.err (!%p651_p7)
}
 0x1ef   :  { %528 = dma.vmem_to_hbm [thread:$0]  %s526_s14, 16, %s784_s4, [#allocation3]  }
 0x1f0   :  { %655 = dma.done.wait [#allocation3], 16  }
 0x1f1   :  { %656 = vsyncadd [#allocation3], 4294967280 }
 0x1f2   :  { %532 = vsyncpa [#allocation3], 1 }

</bundles_post_ra>
